<compile_context>
chip_gen: v7x
topology: tpu7x:2x2x1
jax: 0.10.0
libtpu: 0.0.40
codegen_flags: <defaults>
</compile_context>

<pallas_src>
import functools

import jax
import jax.numpy as jnp
from jax import lax
from jax.experimental import pallas as pl
from jax.experimental.pallas import tpu as pltpu


def _round_up(n, m):
    return ((n + m - 1) // m) * m


def _cdiv(a, b):
    return (a + b - 1) // b


def _ensemble_mlp_kernel(x_ref, w1_ref, b1_ref, w2_ref, b2_ref, o_ref):
    # x_ref : (TB, 3L)       w1_ref: (HID_PAD, 3L)   b1_ref: (1, HID_PAD)
    # w2_ref: (L, HID_PAD)   b2_ref: (1, L)          o_ref : (TB, L)
    # hidden = relu(x @ W1^T + b1) -- feature axes contracted in-kernel; any
    # relayout needed for the MXU is on the tiny weight operand (XLU has slack).
    h = lax.dot_general(
        x_ref[...], w1_ref[...], (((1,), (1,)), ((), ())),
        preferred_element_type=jnp.float32)
    h = jnp.maximum(h + b1_ref[...], 0.0).astype(w2_ref.dtype)
    # y = hidden @ W2^T + b2
    y = lax.dot_general(
        h, w2_ref[...], (((1,), (1,)), ((), ())),
        preferred_element_type=jnp.float32)
    o_ref[...] = (y + b2_ref[...]).astype(o_ref.dtype)


def ensemble_mlp(x, w1, b1, w2, b2, *, tile_b=8192, use_pallas=None,
                 compute_dtype=None):
    """Fused two-layer MLP, forward pass of EnsembleMLP.

    x:  (B, 3*num_labels)            w1: (25, 3*num_labels)   b1: (25,)
    w2: (num_labels, 25)             b2: (num_labels,)
    returns: (B, num_labels) in w1.dtype.
    compute_dtype: optional (e.g. jnp.bfloat16) opt-in fast path; changes
      numerics, accumulation stays float32.
    """
    x = x.astype(w1.dtype)  # mirrors `x.to(self.hidden.weight.dtype)`
    out_dtype = w1.dtype
    B, in_dim = x.shape
    num_labels, hid = w2.shape

    if use_pallas is None:
        # Need a handful of grid steps before the custom-call / per-step
        # overhead beats XLA's fused two-matmul path for this tiny MLP.
        use_pallas = B >= 2 * tile_b
    if not use_pallas:
        h = jnp.maximum(x @ w1.T + b1, 0.0)
        return (h @ w2.T + b2).astype(out_dtype)

    # --- layout prep (tiny, one-time) ----------------------------------------
    hid_pad = _round_up(hid, 8)  # 25 -> 32: clean f32 sublane groups
    w1p = jnp.pad(w1, ((0, hid_pad - hid), (0, 0)))            # (32, 3L)
    b1p = jnp.pad(b1, (0, hid_pad - hid)).reshape(1, hid_pad)  # (1, 32)
    b1p = b1p.astype(jnp.float32)
    w2p = jnp.pad(w2, ((0, 0), (0, hid_pad - hid)))            # (L, 32)
    b2p = b2.reshape(1, num_labels).astype(jnp.float32)

    if compute_dtype is not None:  # opt-in bf16 (etc.) fast path
        x = x.astype(compute_dtype)
        w1p = w1p.astype(compute_dtype)
        w2p = w2p.astype(compute_dtype)

    # Pad the batch only up to a multiple of 128 (bounded waste); ragged last
    # grid blocks are handled by Pallas.
    B_pad = _round_up(B, 128)
    if B_pad != B:
        x = jnp.pad(x, ((0, B_pad - B), (0, 0)))

    block_b = min(_round_up(max(tile_b, 128), 128), B_pad)
    # Keep >= 2 grid steps when possible so both v7x TensorCores get work.
    if _cdiv(B_pad, block_b) < 2 and B_pad >= 2 * 128:
        block_b = _round_up(_cdiv(B_pad, 2), 128)
    grid = (_cdiv(B_pad, block_b),)

    out = pl.pallas_call(
        _ensemble_mlp_kernel,
        out_shape=jax.ShapeDtypeStruct((B_pad, num_labels), out_dtype),
        grid=grid,
        in_specs=[
            # x marches along the batch axis in its natural layout.
            pl.BlockSpec((block_b, in_dim), lambda i: (i, 0)),
            # Weights / biases: constant block index -> stay VMEM-resident.
            pl.BlockSpec(w1p.shape, lambda i: (0, 0)),
            pl.BlockSpec(b1p.shape, lambda i: (0, 0)),
            pl.BlockSpec(w2p.shape, lambda i: (0, 0)),
            pl.BlockSpec(b2p.shape, lambda i: (0, 0)),
        ],
        out_specs=pl.BlockSpec((block_b, num_labels), lambda i: (i, 0)),
        compiler_params=pltpu.CompilerParams(
            dimension_semantics=("parallel",),  # megacore sharding on v7x
        ),
    )(x, w1p, b1p, w2p, b2p)

    return out[:B] if B_pad != B else out


def init_params(key, num_labels):
    """Deterministic param init matching the PyTorch module (PyTorch layout)."""
    in_dim = 3 * num_labels
    hid_dim = 25
    k1, k2, k3, k4 = jax.random.split(key, 4)
    lim1 = 1.0 / jnp.sqrt(in_dim)
    lim2 = 1.0 / jnp.sqrt(hid_dim)
    w1 = jax.random.uniform(k1, (hid_dim, in_dim), jnp.float32, -lim1, lim1)
    b1 = jax.random.uniform(k2, (hid_dim,), jnp.float32, -lim1, lim1)
    w2 = jax.random.uniform(k3, (num_labels, hid_dim), jnp.float32, -lim2, lim2)
    b2 = jax.random.uniform(k4, (num_labels,), jnp.float32, -lim2, lim2)
    return w1, b1, w2, b2


def _reference(x, w1, b1, w2, b2):
    h = jnp.maximum(x @ w1.T + b1, 0.0)
    return h @ w2.T + b2


if __name__ == "__main__":
    num_labels = 16
    key = jax.random.PRNGKey(0)
    kp, kx, kx2 = jax.random.split(key, 3)
    w1, b1, w2, b2 = init_params(kp, num_labels)

    run = jax.jit(functools.partial(ensemble_mlp, use_pallas=True))

    # Small batch (forces the Pallas path; single 128-row padded block).
    batch = 4
    x = jax.random.normal(kx, (batch, 3 * num_labels), jnp.float32)
    y = jax.block_until_ready(run(x, w1, b1, w2, b2))
    assert y.shape == (batch, num_labels)
    assert jnp.allclose(y, _reference(x, w1, b1, w2, b2), atol=1e-4, rtol=1e-5)

    # Non-multiple-of-128 batch: exercises the 128-row pad plus a 2-step
    # parallel grid with a ragged last block.
    batch2 = 777
    x2 = jax.random.normal(kx2, (batch2, 3 * num_labels), jnp.float32)
    y2 = jax.block_until_ready(run(x2, w1, b1, w2, b2))
    assert y2.shape == (batch2, num_labels)
    assert jnp.allclose(y2, _reference(x2, w1, b1, w2, b2), atol=1e-4, rtol=1e-5)

    print("KERNEL_OK")
</pallas_src>

<mosaic_0001>
module attributes {stable_mosaic.version = 11 : i64} {
  func.func @_ensemble_mlp_kernel(%arg0: i32, %arg1: memref<128x48xf32, #tpu.memory_space<vmem>>, %arg2: memref<32x48xf32, #tpu.memory_space<vmem>>, %arg3: memref<1x32xf32, #tpu.memory_space<vmem>>, %arg4: memref<16x32xf32, #tpu.memory_space<vmem>>, %arg5: memref<1x16xf32, #tpu.memory_space<vmem>>, %arg6: memref<128x16xf32, #tpu.memory_space<vmem>>) attributes {dimension_semantics = [#tpu.dimension_semantics<parallel>], iteration_bounds = array<i64: 1>, scalar_prefetch = 0 : i64, scratch_operands = 0 : i64, tpu.core_type = #tpu.core_type<tc>, window_params = [{transform_indices = @transform_0, window_bounds = array<i64: 128, 48>}, {pipeline_mode = #tpu.pipeline_mode<synchronous>, transform_indices = @transform_1, window_bounds = array<i64: 32, 48>}, {pipeline_mode = #tpu.pipeline_mode<synchronous>, transform_indices = @transform_2, window_bounds = array<i64: 1, 32>}, {pipeline_mode = #tpu.pipeline_mode<synchronous>, transform_indices = @transform_3, window_bounds = array<i64: 16, 32>}, {pipeline_mode = #tpu.pipeline_mode<synchronous>, transform_indices = @transform_4, window_bounds = array<i64: 1, 16>}, {transform_indices = @transform_5, window_bounds = array<i64: 128, 16>}]} {
    %c0 = arith.constant 0 : index
    %c0_0 = arith.constant 0 : index
    %0 = vector.load %arg1[%c0, %c0_0] : memref<128x48xf32, #tpu.memory_space<vmem>>, vector<128x48xf32>
    %c0_1 = arith.constant 0 : index
    %c0_2 = arith.constant 0 : index
    %1 = vector.load %arg2[%c0_1, %c0_2] : memref<32x48xf32, #tpu.memory_space<vmem>>, vector<32x48xf32>
    %cst = arith.constant dense<0.000000e+00> : vector<128x32xf32>
    %2 = tpu.matmul %0, %1, %cst {dimension_numbers = #tpu.dot_dimension_numbers<[1], [1], [0], [0], [0, 0, 1, 0], [], []>} : vector<128x48xf32>, vector<32x48xf32>, vector<128x32xf32> -> vector<128x32xf32>
    %c0_3 = arith.constant 0 : index
    %c0_4 = arith.constant 0 : index
    %3 = vector.load %arg3[%c0_3, %c0_4] : memref<1x32xf32, #tpu.memory_space<vmem>>, vector<1x32xf32>
    %4 = vector.broadcast %3 : vector<1x32xf32> to vector<128x32xf32>
    %5 = arith.addf %2, %4 : vector<128x32xf32>
    %cst_5 = arith.constant 0.000000e+00 : f32
    %6 = vector.broadcast %cst_5 : f32 to vector<128x32xf32>
    %7 = arith.maximumf %5, %6 : vector<128x32xf32>
    %c0_6 = arith.constant 0 : index
    %c0_7 = arith.constant 0 : index
    %8 = vector.load %arg4[%c0_6, %c0_7] : memref<16x32xf32, #tpu.memory_space<vmem>>, vector<16x32xf32>
    %cst_8 = arith.constant dense<0.000000e+00> : vector<128x16xf32>
    %9 = tpu.matmul %7, %8, %cst_8 {dimension_numbers = #tpu.dot_dimension_numbers<[1], [1], [0], [0], [0, 0, 1, 0], [], []>} : vector<128x32xf32>, vector<16x32xf32>, vector<128x16xf32> -> vector<128x16xf32>
    %c0_9 = arith.constant 0 : index
    %c0_10 = arith.constant 0 : index
    %10 = vector.load %arg5[%c0_9, %c0_10] : memref<1x16xf32, #tpu.memory_space<vmem>>, vector<1x16xf32>
    %11 = vector.broadcast %10 : vector<1x16xf32> to vector<128x16xf32>
    %12 = arith.addf %9, %11 : vector<128x16xf32>
    %c0_11 = arith.constant 0 : index
    %c0_12 = arith.constant 0 : index
    %13 = vector.load %arg6[%c0_11, %c0_12] : memref<128x16xf32, #tpu.memory_space<vmem>>, vector<128x16xf32>
    tpu.vector_store %arg6[%c0_11, %c0_12], %12 {strides = array<i32>} : memref<128x16xf32, #tpu.memory_space<vmem>>, vector<128x16xf32>,
    return
  }
  func.func @transform_0(%arg0: i32) -> (i32, i32) {
    %c0_i32 = arith.constant 0 : i32
    %c0_i32_0 = arith.constant 0 : i32
    return %arg0, %c0_i32 : i32, i32
  }
  func.func @transform_1(%arg0: i32) -> (i32, i32) {
    %c0_i32 = arith.constant 0 : i32
    %c0_i32_0 = arith.constant 0 : i32
    %c0_i32_1 = arith.constant 0 : i32
    return %c0_i32, %c0_i32_0 : i32, i32
  }
  func.func @transform_2(%arg0: i32) -> (i32, i32) {
    %c0_i32 = arith.constant 0 : i32
    %c0_i32_0 = arith.constant 0 : i32
    %c0_i32_1 = arith.constant 0 : i32
    return %c0_i32, %c0_i32_0 : i32, i32
  }
  func.func @transform_3(%arg0: i32) -> (i32, i32) {
    %c0_i32 = arith.constant 0 : i32
    %c0_i32_0 = arith.constant 0 : i32
    %c0_i32_1 = arith.constant 0 : i32
    return %c0_i32, %c0_i32_0 : i32, i32
  }
  func.func @transform_4(%arg0: i32) -> (i32, i32) {
    %c0_i32 = arith.constant 0 : i32
    %c0_i32_0 = arith.constant 0 : i32
    %c0_i32_1 = arith.constant 0 : i32
    return %c0_i32, %c0_i32_0 : i32, i32
  }
  func.func @transform_5(%arg0: i32) -> (i32, i32) {
    %c0_i32 = arith.constant 0 : i32
    %c0_i32_0 = arith.constant 0 : i32
    return %arg0, %c0_i32 : i32, i32
  }
}

</mosaic_0001>

<bundles_post_ra>
// kernel: ensemble_mlp.1
= control target key start
LH: loop header
LB: loop body
LE: loop exit
PB: predicated region body
PF: predicated region fallthrough
CT: control target
= control target key end

     0   :  { %vm47_vm0 = vcmask 392192   ;;  %vm278_vm2 = vcmask 261120   ;;  %vm478_vm4 = vcmask 130048   ;;  %s869_s1 = inlined_call_operand.vmem [shape: f32[32,48], index: 1, kind: input, shape index: {}]   ;;  %s870_s0 = inlined_call_operand.vmem [shape: f32[128,48], index: 0, kind: input, shape index: {}]   ;;  %s871_s3 = inlined_call_operand.vmem [shape: f32[16,32], index: 3, kind: input, shape index: {}]   ;;  %s872_s2 = inlined_call_operand.vmem [shape: f32[1,32], index: 2, kind: input, shape index: {}]   ;;  %s873_s4 = inlined_call_operand.vmem [shape: f32[1,16], index: 4, kind: input, shape index: {}]   ;;  %s874_s5 = inlined_call_operand.vmem [shape: f32[128,16], index: 5, kind: output, shape index: {}]  }
   0x1   :  { %v36_v0 = vld [vmem:[%s869_s1] sm:$0xff]  ;;  %v37_v1 = vld [vmem:[%s869_s1 + $0x8] sm:$0xff]  ;;  %vm693_vm1 = vmpackc.low %vm47_vm0, %vm47_vm0 }
   0x2   :  { %v637_v3 = vpack.c.bf16 %v37_v1, %v36_v0  ;;  %v38_v4 = vld [vmem:[%s869_s1 + $0x10] sm:$0xff]  ;;  %v39_v5 = vld [vmem:[%s869_s1 + $0x18] sm:$0xff]  ;;  %v20_v6 = vld [vmem:[%s870_s0] sm:$0xff] }
   0x3   :  { %v643_v7 = vpack.c.bf16 %v39_v5, %v38_v4  ;;  %585 = vmatprep.mubr.msk.f32.mxu0 %vm47_vm0, %v20_v6  ;;  %v269_v8 = vld [vmem:[%s871_s3] sm:$0xff]  ;;  %v270_v9 = vld [vmem:[%s871_s3 + $0x8] sm:$0xff]  ;;  %vm650_vm3 = vmpackc.low %vm278_vm2, %vm278_vm2 }
   0x4   :  { %639 = vmatprep.subr.msk.bf16.mxu0 %vm693_vm1, %v637_v3  ;;  %v649_v10 = vpack.c.bf16 %v270_v9, %v269_v8  ;;  %v21_v11 = vld [vmem:[%s870_s0 + $0x8] sm:$0xff]  ;;  %v22_v12 = vld [vmem:[%s870_s0 + $0x10] sm:$0xff]  ;;  %v23_v13 = vld [vmem:[%s870_s0 + $0x18] sm:$0xff] }
   0x5   :  { %642 = vmatpush3.bf16.xpose.msk.msra.mxu0 %vm693_vm1, %v637_v3  ;;  %v24_v14 = vld [vmem:[%s870_s0 + $0x20] sm:$0xff]  ;;  %v25_v15 = vld [vmem:[%s870_s0 + $0x28] sm:$0xff]  ;;  %v26_v16 = vld [vmem:[%s870_s0 + $0x30] sm:$0xff] }
   0x6   :  { %645 = vmatprep.subr.msk.bf16.mxu0 %vm693_vm1, %v643_v7  ;;  %651 = vmatprep.subr.msk.bf16.mxu1 %vm650_vm3, %v649_v10  ;;  %v27_v17 = vld [vmem:[%s870_s0 + $0x38] sm:$0xff]  ;;  %v28_v18 = vld [vmem:[%s870_s0 + $0x40] sm:$0xff]  ;;  %v29_v19 = vld [vmem:[%s870_s0 + $0x48] sm:$0xff] }
   0x7   :  { %654 = vmatpush3.bf16.xpose.msk.msra.mxu1 %vm650_vm3, %v649_v10  ;;  %v30_v20 = vld [vmem:[%s870_s0 + $0x50] sm:$0xff]  ;;  %v31_v21 = vld [vmem:[%s870_s0 + $0x58] sm:$0xff]  ;;  %v32_v22 = vld [vmem:[%s870_s0 + $0x60] sm:$0xff] }
   0x8   :  { %v33_v23 = vld [vmem:[%s870_s0 + $0x68] sm:$0xff]  ;;  %v34_v24 = vld [vmem:[%s870_s0 + $0x70] sm:$0xff]  ;;  %v35_v25 = vld [vmem:[%s870_s0 + $0x78] sm:$0xff] }
   0x9   :  { %v499_v26 = vld [vmem:[%s872_s2] ss:$0 sm:$0xff] }
   0xd   :  { %648 = vmatpush3.bf16.xpose.msk.msra.mxu0 %vm693_vm1, %v643_v7 }
  0x14   :  { %586 = vmatmul.mubr.msk.f32.vlgmr.msra.gmra.mrb[0].mxu0 %vm47_vm0, %v21_v11  ;;  %v520_v11 = vld [vmem:[%s873_s4] ss:$0 sm:$0xff] }
  0x15   :  { %588 = vmatprep.mubr.msk.f32.mxu0 %vm47_vm0, %v22_v12 }
  0x18   :  { %589 = vmatmul.mubr.msk.f32.gmra.mrb[2].mxu0 %vm47_vm0, %v23_v13 }
  0x19   :  { %591 = vmatprep.mubr.msk.f32.mxu0 %vm47_vm0, %v24_v14 }
  0x1c   :  { %592 = vmatmul.mubr.msk.f32.gmra.mrb[4].mxu0 %vm47_vm0, %v25_v15 }
  0x1d   :  { %594 = vmatprep.mubr.msk.f32.mxu0 %vm47_vm0, %v26_v16 }
  0x20   :  { %595 = vmatmul.mubr.msk.f32.gmra.mrb[6].mxu0 %vm47_vm0, %v27_v17 }
  0x21   :  { %597 = vmatprep.mubr.msk.f32.mxu0 %vm47_vm0, %v28_v18 }
  0x24   :  { %598 = vmatmul.mubr.msk.f32.gmra.mrb[8].mxu0 %vm47_vm0, %v29_v19 }
  0x25   :  { %600 = vmatprep.mubr.msk.f32.mxu0 %vm47_vm0, %v30_v20 }
  0x28   :  { %601 = vmatmul.mubr.msk.f32.gmra.mrb[10].mxu0 %vm47_vm0, %v31_v21 }
  0x29   :  { %603 = vmatprep.mubr.msk.f32.mxu0 %vm47_vm0, %v32_v22 }
  0x2c   :  { %604 = vmatmul.mubr.msk.f32.gmra.mrb[12].mxu0 %vm47_vm0, %v33_v23 }
  0x2d   :  { %606 = vmatprep.mubr.msk.f32.mxu0 %vm47_vm0, %v34_v24 }
  0x30   :  { %607 = vmatmul.mubr.msk.f32.gmra.mrb[14].mxu0 %vm47_vm0, %v35_v25 }
  0xe7   :  { %v587_v27 = vpop.f32.mrb[0].mxu0 }
  0xe8   :  { %v180_v28 = vadd.f32 %v587_v27, %v499_v26  ;;  %v174_v29 = vpop.f32.mrb[1].mxu0 }
  0xe9   :  { %v175_v30 = vadd.f32 %v499_v26, %v174_v29 }
  0xea   :  { %v254_v33 = vmax.f32 %v180_v28, 0.0 }
  0xeb   :  { %v253_v31 = vmax.f32 %v175_v30, 0.0  ;;  %v590_v32 = vpop.f32.mrb[2].mxu0 }
  0xec   :  { %v190_v34 = vadd.f32 %v590_v32, %v499_v26  ;;  %v184_v35 = vpop.f32.mrb[3].mxu0 }
  0xed   :  { %v185_v36 = vadd.f32 %v499_v26, %v184_v35  ;;  %613 = vmatprep.mubr.msk.f32.mxu1 %vm278_vm2, %v253_v31 }
  0xee   :  { %614 = vmatmul.mubr.msk.f32.vlgmr.msra.gmra.mrb[0].mxu1 %vm278_vm2, %v254_v33  ;;  %v256_v39 = vmax.f32 %v190_v34, 0.0 }
  0xef   :  { %v255_v37 = vmax.f32 %v185_v36, 0.0  ;;  %v593_v38 = vpop.f32.mrb[4].mxu0 }
  0xf0   :  { %v200_v40 = vadd.f32 %v593_v38, %v499_v26  ;;  %v194_v41 = vpop.f32.mrb[5].mxu0 }
  0xf1   :  { %v195_v42 = vadd.f32 %v499_v26, %v194_v41  ;;  %616 = vmatprep.mubr.msk.f32.mxu1 %vm278_vm2, %v255_v37 }
  0xf2   :  { %617 = vmatmul.mubr.msk.f32.gmra.mrb[2].mxu1 %vm278_vm2, %v256_v39  ;;  %v258_v45 = vmax.f32 %v200_v40, 0.0 }
  0xf3   :  { %v257_v43 = vmax.f32 %v195_v42, 0.0  ;;  %v596_v44 = vpop.f32.mrb[6].mxu0 }
  0xf4   :  { %v210_v46 = vadd.f32 %v596_v44, %v499_v26  ;;  %v204_v47 = vpop.f32.mrb[7].mxu0 }
  0xf5   :  { %v205_v48 = vadd.f32 %v499_v26, %v204_v47  ;;  %619 = vmatprep.mubr.msk.f32.mxu1 %vm278_vm2, %v257_v43 }
  0xf6   :  { %620 = vmatmul.mubr.msk.f32.gmra.mrb[4].mxu1 %vm278_vm2, %v258_v45  ;;  %v260_v51 = vmax.f32 %v210_v46, 0.0 }
  0xf7   :  { %v259_v49 = vmax.f32 %v205_v48, 0.0  ;;  %v599_v50 = vpop.f32.mrb[8].mxu0 }
  0xf8   :  { %v220_v52 = vadd.f32 %v599_v50, %v499_v26  ;;  %v214_v53 = vpop.f32.mrb[9].mxu0 }
  0xf9   :  { %v215_v54 = vadd.f32 %v499_v26, %v214_v53  ;;  %622 = vmatprep.mubr.msk.f32.mxu1 %vm278_vm2, %v259_v49 }
  0xfa   :  { %623 = vmatmul.mubr.msk.f32.gmra.mrb[6].mxu1 %vm278_vm2, %v260_v51  ;;  %v262_v57 = vmax.f32 %v220_v52, 0.0 }
  0xfb   :  { %v261_v55 = vmax.f32 %v215_v54, 0.0  ;;  %v602_v56 = vpop.f32.mrb[10].mxu0 }
  0xfc   :  { %v230_v58 = vadd.f32 %v602_v56, %v499_v26  ;;  %v224_v59 = vpop.f32.mrb[11].mxu0 }
  0xfd   :  { %v225_v60 = vadd.f32 %v499_v26, %v224_v59  ;;  %625 = vmatprep.mubr.msk.f32.mxu1 %vm278_vm2, %v261_v55 }
  0xfe   :  { %626 = vmatmul.mubr.msk.f32.gmra.mrb[8].mxu1 %vm278_vm2, %v262_v57  ;;  %v264_v63 = vmax.f32 %v230_v58, 0.0 }
  0xff   :  { %v263_v61 = vmax.f32 %v225_v60, 0.0  ;;  %v605_v62 = vpop.f32.mrb[12].mxu0 }
 0x100   :  { %v240_v0 = vadd.f32 %v605_v62, %v499_v26  ;;  %v234_v1 = vpop.f32.mrb[13].mxu0 }
 0x101   :  { %v235_v2 = vadd.f32 %v499_v26, %v234_v1  ;;  %628 = vmatprep.mubr.msk.f32.mxu1 %vm278_vm2, %v263_v61 }
 0x102   :  { %629 = vmatmul.mubr.msk.f32.gmra.mrb[10].mxu1 %vm278_vm2, %v264_v63  ;;  %v266_v5 = vmax.f32 %v240_v0, 0.0 }
 0x103   :  { %v265_v3 = vmax.f32 %v235_v2, 0.0  ;;  %v608_v4 = vpop.f32.mrb[14].mxu0 }
 0x104   :  { %v250_v6 = vadd.f32 %v608_v4, %v499_v26  ;;  %v244_v7 = vpop.f32.mrb[15].mxu0 }
 0x105   :  { %v245_v8 = vadd.f32 %v499_v26, %v244_v7  ;;  %631 = vmatprep.mubr.msk.f32.mxu1 %vm278_vm2, %v265_v3 }
 0x106   :  { %632 = vmatmul.mubr.msk.f32.gmra.mrb[12].mxu1 %vm278_vm2, %v266_v5  ;;  %v268_v10 = vmax.f32 %v250_v6, 0.0 }
 0x107   :  { %v267_v9 = vmax.f32 %v245_v8, 0.0 }
 0x109   :  { %634 = vmatprep.mubr.msk.f32.mxu1 %vm278_vm2, %v267_v9 }
 0x10a   :  { %635 = vmatmul.mubr.msk.f32.gmra.mrb[14].mxu1 %vm278_vm2, %v268_v10 }
 0x1c1   :  { %v615_v12 = vpop.f32.mrb[0].mxu1 }
 0x1c2   :  { %v405_v13 = vadd.f32 %v615_v12, %v520_v11  ;;  %v399_v14 = vpop.f32.mrb[1].mxu1 }
 0x1c3   :  { %v400_v15 = vadd.f32 %v520_v11, %v399_v14 }
 0x1c4   :  { %480 = vst.msk [vmem:[%s874_s5 + $0x8] sm:$0xff] %vm478_vm4, %v405_v13 }
 0x1c5   :  { %479 = vst.msk [vmem:[%s874_s5] sm:$0xff] %vm478_vm4, %v400_v15  ;;  %v618_v16 = vpop.f32.mrb[2].mxu1 }
 0x1c6   :  { %v415_v17 = vadd.f32 %v618_v16, %v520_v11  ;;  %v409_v18 = vpop.f32.mrb[3].mxu1 }
 0x1c7   :  { %v410_v19 = vadd.f32 %v520_v11, %v409_v18 }
 0x1c8   :  { %482 = vst.msk [vmem:[%s874_s5 + $0x18] sm:$0xff] %vm478_vm4, %v415_v17 }
 0x1c9   :  { %481 = vst.msk [vmem:[%s874_s5 + $0x10] sm:$0xff] %vm478_vm4, %v410_v19  ;;  %v621_v20 = vpop.f32.mrb[4].mxu1 }
 0x1ca   :  { %v425_v21 = vadd.f32 %v621_v20, %v520_v11  ;;  %v419_v22 = vpop.f32.mrb[5].mxu1 }
 0x1cb   :  { %v420_v23 = vadd.f32 %v520_v11, %v419_v22 }
 0x1cc   :  { %484 = vst.msk [vmem:[%s874_s5 + $0x28] sm:$0xff] %vm478_vm4, %v425_v21 }
 0x1cd   :  { %483 = vst.msk [vmem:[%s874_s5 + $0x20] sm:$0xff] %vm478_vm4, %v420_v23  ;;  %v624_v24 = vpop.f32.mrb[6].mxu1 }
 0x1ce   :  { %v435_v25 = vadd.f32 %v624_v24, %v520_v11  ;;  %v429_v26 = vpop.f32.mrb[7].mxu1 }
 0x1cf   :  { %v430_v27 = vadd.f32 %v520_v11, %v429_v26 }
 0x1d0   :  { %486 = vst.msk [vmem:[%s874_s5 + $0x38] sm:$0xff] %vm478_vm4, %v435_v25 }
 0x1d1   :  { %485 = vst.msk [vmem:[%s874_s5 + $0x30] sm:$0xff] %vm478_vm4, %v430_v27  ;;  %v627_v28 = vpop.f32.mrb[8].mxu1 }
 0x1d2   :  { %v445_v29 = vadd.f32 %v627_v28, %v520_v11  ;;  %v439_v30 = vpop.f32.mrb[9].mxu1 }
 0x1d3   :  { %v440_v31 = vadd.f32 %v520_v11, %v439_v30 }
 0x1d4   :  { %488 = vst.msk [vmem:[%s874_s5 + $0x48] sm:$0xff] %vm478_vm4, %v445_v29 }
 0x1d5   :  { %487 = vst.msk [vmem:[%s874_s5 + $0x40] sm:$0xff] %vm478_vm4, %v440_v31  ;;  %v630_v32 = vpop.f32.mrb[10].mxu1 }
 0x1d6   :  { %v455_v33 = vadd.f32 %v630_v32, %v520_v11  ;;  %v449_v34 = vpop.f32.mrb[11].mxu1 }
 0x1d7   :  { %v450_v35 = vadd.f32 %v520_v11, %v449_v34 }
 0x1d8   :  { %490 = vst.msk [vmem:[%s874_s5 + $0x58] sm:$0xff] %vm478_vm4, %v455_v33 }
 0x1d9   :  { %489 = vst.msk [vmem:[%s874_s5 + $0x50] sm:$0xff] %vm478_vm4, %v450_v35  ;;  %v633_v36 = vpop.f32.mrb[12].mxu1 }
 0x1da   :  { %v465_v37 = vadd.f32 %v633_v36, %v520_v11  ;;  %v459_v38 = vpop.f32.mrb[13].mxu1 }
 0x1db   :  { %v460_v39 = vadd.f32 %v520_v11, %v459_v38 }
 0x1dc   :  { %492 = vst.msk [vmem:[%s874_s5 + $0x68] sm:$0xff] %vm478_vm4, %v465_v37 }
 0x1dd   :  { %491 = vst.msk [vmem:[%s874_s5 + $0x60] sm:$0xff] %vm478_vm4, %v460_v39  ;;  %v636_v40 = vpop.f32.mrb[14].mxu1 }
 0x1de   :  { %v475_v41 = vadd.f32 %v636_v40, %v520_v11  ;;  %v469_v42 = vpop.f32.mrb[15].mxu1 }
 0x1df   :  { %v470_v43 = vadd.f32 %v520_v11, %v469_v42 }
 0x1e0   :  { %494 = vst.msk [vmem:[%s874_s5 + $0x78] sm:$0xff] %vm478_vm4, %v475_v41 }
 0x1e1   :  { %493 = vst.msk [vmem:[%s874_s5 + $0x70] sm:$0xff] %vm478_vm4, %v470_v43 }

</bundles_post_ra>
